<compile_context>
chip_gen: v5e
topology: v5e:2x2
jax: 0.10.0
libtpu: 0.0.40
codegen_flags: <defaults>
</compile_context>

<pallas_src>
import numpy as np
import jax
import jax.numpy as jnp
from jax.experimental import pallas as pl
from jax.experimental.pallas import tpu as pltpu

EPS = 1e-5          # nn.BatchNorm2d default eps
NEG_SLOPE = 0.02    # LeakyReLU slope

# Sizes implied by the module (28x28 input, View(250))
H1, K1, S1 = 28, 5, 2
HO1 = (H1 - K1) // S1 + 1        # 12
K2, S2 = 3, 2
HO2 = (HO1 - K2) // S2 + 1       # 5
P1 = HO1 * HO1                   # 144 conv1 output positions
P2 = HO2 * HO2                   # 25  conv2 output positions
C = 10                           # channels
KK2 = K2 * K2                    # 9


def _build_sel_flat():
    """Lane-dense conv2 im2col selector, shape (144, 9*25).

    sel[p, kk*25 + q] = 1 iff conv2 patch element kk (= kh*3+kw) of output position
    q (= oh*5+ow) reads conv1 position p (= (2*oh+kh)*12 + (2*ow+kw)).
    """
    sel = np.zeros((P1, KK2 * P2), np.float32)
    for kh in range(K2):
        for kw in range(K2):
            kk = kh * K2 + kw
            for oh in range(HO2):
                for ow in range(HO2):
                    q = oh * HO2 + ow
                    p = (S2 * oh + kh) * HO1 + (S2 * ow + kw)
                    sel[p, kk * P2 + q] = 1.0
    return sel


_SEL_FLAT_NP = _build_sel_flat()


# ---------------------------------------------------------------------------
# Fused Pallas kernel (one grid step == one sample)
# ---------------------------------------------------------------------------
def _disc_kernel(p1t_ref, w1_ref, w2_ref, sel_ref, prm_ref, lw_ref, o_ref):
    # prm columns: 0 conv1_b, 1 bn1_g, 2 bn1_b, 3 conv2_b, 4 bn2_g, 5 bn2_b, 6 lin_b
    p1t = p1t_ref[0]                                                    # (25, 144)

    # ---- Conv1 (as matmul) + bias + LeakyReLU + BatchNorm (batch stats, two-pass var) ----
    y = jnp.dot(w1_ref[...], p1t, preferred_element_type=jnp.float32)   # (10, 144)
    y = y + prm_ref[:, 0:1]
    y = jnp.maximum(y, NEG_SLOPE * y)                                    # LeakyReLU(0.02)
    mean = jnp.sum(y, axis=1, keepdims=True) * (1.0 / P1)                # per-channel mean
    yc = y - mean
    var = jnp.sum(yc * yc, axis=1, keepdims=True) * (1.0 / P1)           # biased batch var
    y = yc * jax.lax.rsqrt(var + EPS) * prm_ref[:, 1:2] + prm_ref[:, 2:3]

    # ---- Conv2: ONE combined selection matmul, then 9 tiny weight matmuls ----
    sel = sel_ref[...].astype(jnp.float32)                               # bf16 -> f32, exact 0/1
    patches = jnp.dot(y, sel, preferred_element_type=jnp.float32)        # (10, 225)
    z = jnp.zeros((C, P2), jnp.float32)
    for kk in range(KK2):                                                # unrolled, independent
        w_kk = w2_ref[:, kk * C:(kk + 1) * C]                            # (10, 10)
        p_kk = patches[:, kk * P2:(kk + 1) * P2]                         # (10, 25)
        z = z + jnp.dot(w_kk, p_kk, preferred_element_type=jnp.float32)  # (10, 25)
    z = z + prm_ref[:, 3:4]
    z = jnp.maximum(z, NEG_SLOPE * z)
    mean2 = jnp.sum(z, axis=1, keepdims=True) * (1.0 / P2)
    zc = z - mean2
    var2 = jnp.sum(zc * zc, axis=1, keepdims=True) * (1.0 / P2)
    z = zc * jax.lax.rsqrt(var2 + EPS) * prm_ref[:, 4:5] + prm_ref[:, 5:6]

    # ---- View(250) -> Linear(250,1) -> Sigmoid ----
    s = jnp.sum(z * lw_ref[...], axis=1, keepdims=True)                  # (10, 1)
    logit = jnp.sum(s, axis=0, keepdims=True) + prm_ref[0:1, 6:7]        # (1, 1)
    o_ref[0] = 1.0 / (1.0 + jnp.exp(-logit))                             # Sigmoid


# ---------------------------------------------------------------------------
# One-time parameter packing (hoisted out of the per-call path)
# ---------------------------------------------------------------------------
def prepare_params(params):
    f32 = jnp.float32
    w1 = params["conv1_w"].reshape(C, K1 * K1).astype(f32)                       # (10, 25)
    # conv2_w (co, ci, kh, kw) -> (co, kk*10 + ci): one lane-dense (10, 90) tile.
    w2 = jnp.transpose(params["conv2_w"], (0, 2, 3, 1)).reshape(C, KK2 * C).astype(f32)
    lw = params["lin_w"].reshape(C, P2).astype(f32)                              # (10, 25)
    prm = jnp.stack(
        [params["conv1_b"], params["bn1_g"], params["bn1_b"],
         params["conv2_b"], params["bn2_g"], params["bn2_b"],
         jnp.broadcast_to(params["lin_b"], (C,))], axis=1).astype(f32)           # (10, 7)
    sel = jnp.asarray(_SEL_FLAT_NP, dtype=jnp.bfloat16)                          # (144, 225)
    return {"w1": w1, "w2": w2, "lw": lw, "prm": prm, "sel": sel}


# ---------------------------------------------------------------------------
# Per-call wrapper: im2col gather (input-dependent) + single batched pallas_call
# ---------------------------------------------------------------------------
def discriminator_forward(x_nchw, packed):
    B = x_nchw.shape[0]
    assert x_nchw.shape[1:] == (1, 28, 28), "module expects 1x28x28 inputs"
    x2d = x_nchw.reshape(B, H1, H1).astype(jnp.float32)

    # conv1 im2col, transposed (K on sublanes, positions on lanes), one gather:
    #   p1t[b, kh*5+kw, oh*12+ow] = x[b, 2*oh+kh, 2*ow+kw]
    r = S1 * jnp.arange(HO1)[None, :] + jnp.arange(K1)[:, None]                  # (5, 12)
    p1t = x2d[:, r[:, None, :, None], r[None, :, None, :]].reshape(B, K1 * K1, P1)

    out = pl.pallas_call(
        _disc_kernel,
        out_shape=jax.ShapeDtypeStruct((B, 1, 1), jnp.float32),
        grid=(B,),
        in_specs=[
            pl.BlockSpec((1, K1 * K1, P1), lambda b: (b, 0, 0)),   # per-sample im2col
            pl.BlockSpec((C, K1 * K1), lambda b: (0, 0)),          # conv1 w  (resident)
            pl.BlockSpec((C, KK2 * C), lambda b: (0, 0)),          # conv2 w  (resident)
            pl.BlockSpec((P1, KK2 * P2), lambda b: (0, 0)),        # selector (resident, bf16)
            pl.BlockSpec((C, 7), lambda b: (0, 0)),                # packed per-channel params
            pl.BlockSpec((C, P2), lambda b: (0, 0)),               # linear w (resident)
        ],
        out_specs=pl.BlockSpec((1, 1, 1), lambda b: (b, 0, 0)),
        compiler_params=pltpu.CompilerParams(dimension_semantics=("parallel",)),
    )(p1t, packed["w1"], packed["w2"], packed["sel"], packed["prm"], packed["lw"])
    return out.reshape(B)                                           # torch shape per sample: (1,)


# ---------------------------------------------------------------------------
# Deterministic parameter initialization (PyTorch-default-like shapes)
# ---------------------------------------------------------------------------
def init_params(key):
    ks = jax.random.split(key, 6)

    def u(k, shape, fan_in):
        bound = 1.0 / (fan_in ** 0.5)
        return jax.random.uniform(k, shape, jnp.float32, -bound, bound)

    return {
        "conv1_w": u(ks[0], (10, 1, 5, 5), 1 * 5 * 5),
        "conv1_b": u(ks[1], (10,), 1 * 5 * 5),
        "bn1_g": jnp.ones((10,), jnp.float32),
        "bn1_b": jnp.zeros((10,), jnp.float32),
        "conv2_w": u(ks[2], (10, 10, 3, 3), 10 * 3 * 3),
        "conv2_b": u(ks[3], (10,), 10 * 3 * 3),
        "bn2_g": jnp.ones((10,), jnp.float32),
        "bn2_b": jnp.zeros((10,), jnp.float32),
        "lin_w": u(ks[4], (1, 250), 250),
        "lin_b": u(ks[5], (1,), 250),
    }


if __name__ == "__main__":
    key = jax.random.PRNGKey(0)
    k_x, k_p = jax.random.split(key)
    B = 4
    x = jax.random.normal(k_x, (B, 1, 28, 28), jnp.float32)
    params = init_params(k_p)

    packed = prepare_params(params)                  # one-time packing, outside the hot path
    fwd = jax.jit(discriminator_forward)
    out = jax.block_until_ready(fwd(x, packed))

    assert out.shape == (B,)
    assert bool(jnp.all((out >= 0.0) & (out <= 1.0)))
    assert bool(jnp.all(jnp.isfinite(out)))
    print("KERNEL_OK")
</pallas_src>

<mosaic_0001>
module attributes {stable_mosaic.version = 11 : i64} {
  func.func @_disc_kernel(%arg0: i32, %arg1: memref<1x25x144xf32, #tpu.memory_space<vmem>>, %arg2: memref<10x25xf32, #tpu.memory_space<vmem>>, %arg3: memref<10x90xf32, #tpu.memory_space<vmem>>, %arg4: memref<144x225xbf16, #tpu.memory_space<vmem>>, %arg5: memref<10x7xf32, #tpu.memory_space<vmem>>, %arg6: memref<10x25xf32, #tpu.memory_space<vmem>>, %arg7: memref<1x1x1xf32, #tpu.memory_space<vmem>>) attributes {dimension_semantics = [#tpu.dimension_semantics<parallel>], iteration_bounds = array<i64: 4>, scalar_prefetch = 0 : i64, scratch_operands = 0 : i64, tpu.core_type = #tpu.core_type<tc>, window_params = [{transform_indices = @transform_0, window_bounds = array<i64: 1, 25, 144>}, {pipeline_mode = #tpu.pipeline_mode<synchronous>, transform_indices = @transform_1, window_bounds = array<i64: 10, 25>}, {pipeline_mode = #tpu.pipeline_mode<synchronous>, transform_indices = @transform_2, window_bounds = array<i64: 10, 90>}, {pipeline_mode = #tpu.pipeline_mode<synchronous>, transform_indices = @transform_3, window_bounds = array<i64: 144, 225>}, {pipeline_mode = #tpu.pipeline_mode<synchronous>, transform_indices = @transform_4, window_bounds = array<i64: 10, 7>}, {pipeline_mode = #tpu.pipeline_mode<synchronous>, transform_indices = @transform_5, window_bounds = array<i64: 10, 25>}, {transform_indices = @transform_6, window_bounds = array<i64: 1, 1, 1>}]} {
    %c0 = arith.constant 0 : index
    %c0_0 = arith.constant 0 : index
    %c0_1 = arith.constant 0 : index
    %0 = vector.load %arg1[%c0, %c0_0, %c0_1] : memref<1x25x144xf32, #tpu.memory_space<vmem>>, vector<1x25x144xf32>
    %1 = vector.shape_cast %0 : vector<1x25x144xf32> to vector<25x144xf32>
    %c0_2 = arith.constant 0 : index
    %c0_3 = arith.constant 0 : index
    %2 = vector.load %arg2[%c0_2, %c0_3] : memref<10x25xf32, #tpu.memory_space<vmem>>, vector<10x25xf32>
    %cst = arith.constant dense<0.000000e+00> : vector<10x144xf32>
    %3 = tpu.matmul %2, %1, %cst {dimension_numbers = #tpu.dot_dimension_numbers<[1], [0], [0], [1], [0, 0, 1, 1], [], []>} : vector<10x25xf32>, vector<25x144xf32>, vector<10x144xf32> -> vector<10x144xf32>
    %c0_4 = arith.constant 0 : index
    %c0_5 = arith.constant 0 : index
    %4 = vector.load %arg5[%c0_4, %c0_5] : memref<10x7xf32, #tpu.memory_space<vmem>>, vector<10x1xf32>
    %5 = vector.broadcast %4 : vector<10x1xf32> to vector<10x144xf32>
    %6 = arith.addf %3, %5 : vector<10x144xf32>
    %cst_6 = arith.constant 2.000000e-02 : f32
    %7 = vector.broadcast %cst_6 : f32 to vector<10x144xf32>
    %8 = arith.mulf %7, %6 : vector<10x144xf32>
    %9 = arith.maximumf %6, %8 : vector<10x144xf32>
    %cst_7 = arith.constant dense<0.000000e+00> : vector<10xf32>
    %10 = vector.multi_reduction <add>, %9, %cst_7 [1] : vector<10x144xf32> to vector<10xf32>
    %11 = vector.shape_cast %10 : vector<10xf32> to vector<10x1xf32>
    %cst_8 = arith.constant 0.0069444445 : f32
    %12 = vector.broadcast %cst_8 : f32 to vector<10x1xf32>
    %13 = arith.mulf %11, %12 : vector<10x1xf32>
    %14 = vector.broadcast %13 : vector<10x1xf32> to vector<10x144xf32>
    %15 = arith.subf %9, %14 : vector<10x144xf32>
    %16 = arith.mulf %15, %15 : vector<10x144xf32>
    %cst_9 = arith.constant dense<0.000000e+00> : vector<10xf32>
    %17 = vector.multi_reduction <add>, %16, %cst_9 [1] : vector<10x144xf32> to vector<10xf32>
    %18 = vector.shape_cast %17 : vector<10xf32> to vector<10x1xf32>
    %cst_10 = arith.constant 0.0069444445 : f32
    %19 = vector.broadcast %cst_10 : f32 to vector<10x1xf32>
    %20 = arith.mulf %18, %19 : vector<10x1xf32>
    %cst_11 = arith.constant 9.99999974E-6 : f32
    %21 = vector.broadcast %cst_11 : f32 to vector<10x1xf32>
    %22 = arith.addf %20, %21 : vector<10x1xf32>
    %23 = math.rsqrt %22 : vector<10x1xf32>
    %24 = vector.broadcast %23 : vector<10x1xf32> to vector<10x144xf32>
    %25 = arith.mulf %15, %24 : vector<10x144xf32>
    %c0_12 = arith.constant 0 : index
    %c1 = arith.constant 1 : index
    %26 = vector.load %arg5[%c0_12, %c1] : memref<10x7xf32, #tpu.memory_space<vmem>>, vector<10x1xf32>
    %27 = vector.broadcast %26 : vector<10x1xf32> to vector<10x144xf32>
    %28 = arith.mulf %25, %27 : vector<10x144xf32>
    %c0_13 = arith.constant 0 : index
    %c2 = arith.constant 2 : index
    %29 = vector.load %arg5[%c0_13, %c2] : memref<10x7xf32, #tpu.memory_space<vmem>>, vector<10x1xf32>
    %30 = vector.broadcast %29 : vector<10x1xf32> to vector<10x144xf32>
    %31 = arith.addf %28, %30 : vector<10x144xf32>
    %c0_14 = arith.constant 0 : index
    %c0_15 = arith.constant 0 : index
    %32 = vector.load %arg4[%c0_14, %c0_15] : memref<144x225xbf16, #tpu.memory_space<vmem>>, vector<144x225xbf16>
    %33 = arith.extf %32 : vector<144x225xbf16> to vector<144x225xf32>
    %cst_16 = arith.constant dense<0.000000e+00> : vector<10x225xf32>
    %34 = tpu.matmul %31, %33, %cst_16 {dimension_numbers = #tpu.dot_dimension_numbers<[1], [0], [0], [1], [0, 0, 1, 1], [], []>} : vector<10x144xf32>, vector<144x225xf32>, vector<10x225xf32> -> vector<10x225xf32>
    %cst_17 = arith.constant 0.000000e+00 : f32
    %35 = vector.broadcast %cst_17 : f32 to vector<10x25xf32>
    %c0_18 = arith.constant 0 : index
    %c0_19 = arith.constant 0 : index
    %36 = vector.load %arg3[%c0_18, %c0_19] : memref<10x90xf32, #tpu.memory_space<vmem>>, vector<10x10xf32>
    %37 = vector.extract_strided_slice %34 {offsets = [0, 0], sizes = [10, 25], strides = [1, 1]} : vector<10x225xf32> to vector<10x25xf32>
    %cst_20 = arith.constant dense<0.000000e+00> : vector<10x25xf32>
    %38 = tpu.matmul %36, %37, %cst_20 {dimension_numbers = #tpu.dot_dimension_numbers<[1], [0], [0], [1], [0, 0, 1, 1], [], []>} : vector<10x10xf32>, vector<10x25xf32>, vector<10x25xf32> -> vector<10x25xf32>
    %39 = arith.addf %35, %38 : vector<10x25xf32>
    %c0_21 = arith.constant 0 : index
    %c10 = arith.constant 10 : index
    %40 = vector.load %arg3[%c0_21, %c10] : memref<10x90xf32, #tpu.memory_space<vmem>>, vector<10x10xf32>
    %41 = vector.extract_strided_slice %34 {offsets = [0, 25], sizes = [10, 25], strides = [1, 1]} : vector<10x225xf32> to vector<10x25xf32>
    %cst_22 = arith.constant dense<0.000000e+00> : vector<10x25xf32>
    %42 = tpu.matmul %40, %41, %cst_22 {dimension_numbers = #tpu.dot_dimension_numbers<[1], [0], [0], [1], [0, 0, 1, 1], [], []>} : vector<10x10xf32>, vector<10x25xf32>, vector<10x25xf32> -> vector<10x25xf32>
    %43 = arith.addf %39, %42 : vector<10x25xf32>
    %c0_23 = arith.constant 0 : index
    %c20 = arith.constant 20 : index
    %44 = vector.load %arg3[%c0_23, %c20] : memref<10x90xf32, #tpu.memory_space<vmem>>, vector<10x10xf32>
    %45 = vector.extract_strided_slice %34 {offsets = [0, 50], sizes = [10, 25], strides = [1, 1]} : vector<10x225xf32> to vector<10x25xf32>
    %cst_24 = arith.constant dense<0.000000e+00> : vector<10x25xf32>
    %46 = tpu.matmul %44, %45, %cst_24 {dimension_numbers = #tpu.dot_dimension_numbers<[1], [0], [0], [1], [0, 0, 1, 1], [], []>} : vector<10x10xf32>, vector<10x25xf32>, vector<10x25xf32> -> vector<10x25xf32>
    %47 = arith.addf %43, %46 : vector<10x25xf32>
    %c0_25 = arith.constant 0 : index
    %c30 = arith.constant 30 : index
    %48 = vector.load %arg3[%c0_25, %c30] : memref<10x90xf32, #tpu.memory_space<vmem>>, vector<10x10xf32>
    %49 = vector.extract_strided_slice %34 {offsets = [0, 75], sizes = [10, 25], strides = [1, 1]} : vector<10x225xf32> to vector<10x25xf32>
    %cst_26 = arith.constant dense<0.000000e+00> : vector<10x25xf32>
    %50 = tpu.matmul %48, %49, %cst_26 {dimension_numbers = #tpu.dot_dimension_numbers<[1], [0], [0], [1], [0, 0, 1, 1], [], []>} : vector<10x10xf32>, vector<10x25xf32>, vector<10x25xf32> -> vector<10x25xf32>
    %51 = arith.addf %47, %50 : vector<10x25xf32>
    %c0_27 = arith.constant 0 : index
    %c40 = arith.constant 40 : index
    %52 = vector.load %arg3[%c0_27, %c40] : memref<10x90xf32, #tpu.memory_space<vmem>>, vector<10x10xf32>
    %53 = vector.extract_strided_slice %34 {offsets = [0, 100], sizes = [10, 25], strides = [1, 1]} : vector<10x225xf32> to vector<10x25xf32>
    %cst_28 = arith.constant dense<0.000000e+00> : vector<10x25xf32>
    %54 = tpu.matmul %52, %53, %cst_28 {dimension_numbers = #tpu.dot_dimension_numbers<[1], [0], [0], [1], [0, 0, 1, 1], [], []>} : vector<10x10xf32>, vector<10x25xf32>, vector<10x25xf32> -> vector<10x25xf32>
    %55 = arith.addf %51, %54 : vector<10x25xf32>
    %c0_29 = arith.constant 0 : index
    %c50 = arith.constant 50 : index
    %56 = vector.load %arg3[%c0_29, %c50] : memref<10x90xf32, #tpu.memory_space<vmem>>, vector<10x10xf32>
    %57 = vector.extract_strided_slice %34 {offsets = [0, 125], sizes = [10, 25], strides = [1, 1]} : vector<10x225xf32> to vector<10x25xf32>
    %cst_30 = arith.constant dense<0.000000e+00> : vector<10x25xf32>
    %58 = tpu.matmul %56, %57, %cst_30 {dimension_numbers = #tpu.dot_dimension_numbers<[1], [0], [0], [1], [0, 0, 1, 1], [], []>} : vector<10x10xf32>, vector<10x25xf32>, vector<10x25xf32> -> vector<10x25xf32>
    %59 = arith.addf %55, %58 : vector<10x25xf32>
    %c0_31 = arith.constant 0 : index
    %c60 = arith.constant 60 : index
    %60 = vector.load %arg3[%c0_31, %c60] : memref<10x90xf32, #tpu.memory_space<vmem>>, vector<10x10xf32>
    %61 = vector.extract_strided_slice %34 {offsets = [0, 150], sizes = [10, 25], strides = [1, 1]} : vector<10x225xf32> to vector<10x25xf32>
    %cst_32 = arith.constant dense<0.000000e+00> : vector<10x25xf32>
    %62 = tpu.matmul %60, %61, %cst_32 {dimension_numbers = #tpu.dot_dimension_numbers<[1], [0], [0], [1], [0, 0, 1, 1], [], []>} : vector<10x10xf32>, vector<10x25xf32>, vector<10x25xf32> -> vector<10x25xf32>
    %63 = arith.addf %59, %62 : vector<10x25xf32>
    %c0_33 = arith.constant 0 : index
    %c70 = arith.constant 70 : index
    %64 = vector.load %arg3[%c0_33, %c70] : memref<10x90xf32, #tpu.memory_space<vmem>>, vector<10x10xf32>
    %65 = vector.extract_strided_slice %34 {offsets = [0, 175], sizes = [10, 25], strides = [1, 1]} : vector<10x225xf32> to vector<10x25xf32>
    %cst_34 = arith.constant dense<0.000000e+00> : vector<10x25xf32>
    %66 = tpu.matmul %64, %65, %cst_34 {dimension_numbers = #tpu.dot_dimension_numbers<[1], [0], [0], [1], [0, 0, 1, 1], [], []>} : vector<10x10xf32>, vector<10x25xf32>, vector<10x25xf32> -> vector<10x25xf32>
    %67 = arith.addf %63, %66 : vector<10x25xf32>
    %c0_35 = arith.constant 0 : index
    %c80 = arith.constant 80 : index
    %68 = vector.load %arg3[%c0_35, %c80] : memref<10x90xf32, #tpu.memory_space<vmem>>, vector<10x10xf32>
    %69 = vector.extract_strided_slice %34 {offsets = [0, 200], sizes = [10, 25], strides = [1, 1]} : vector<10x225xf32> to vector<10x25xf32>
    %cst_36 = arith.constant dense<0.000000e+00> : vector<10x25xf32>
    %70 = tpu.matmul %68, %69, %cst_36 {dimension_numbers = #tpu.dot_dimension_numbers<[1], [0], [0], [1], [0, 0, 1, 1], [], []>} : vector<10x10xf32>, vector<10x25xf32>, vector<10x25xf32> -> vector<10x25xf32>
    %71 = arith.addf %67, %70 : vector<10x25xf32>
    %c0_37 = arith.constant 0 : index
    %c3 = arith.constant 3 : index
    %72 = vector.load %arg5[%c0_37, %c3] : memref<10x7xf32, #tpu.memory_space<vmem>>, vector<10x1xf32>
    %73 = vector.broadcast %72 : vector<10x1xf32> to vector<10x25xf32>
    %74 = arith.addf %71, %73 : vector<10x25xf32>
    %cst_38 = arith.constant 2.000000e-02 : f32
    %75 = vector.broadcast %cst_38 : f32 to vector<10x25xf32>
    %76 = arith.mulf %75, %74 : vector<10x25xf32>
    %77 = arith.maximumf %74, %76 : vector<10x25xf32>
    %cst_39 = arith.constant dense<0.000000e+00> : vector<10xf32>
    %78 = vector.multi_reduction <add>, %77, %cst_39 [1] : vector<10x25xf32> to vector<10xf32>
    %79 = vector.shape_cast %78 : vector<10xf32> to vector<10x1xf32>
    %cst_40 = arith.constant 4.000000e-02 : f32
    %80 = vector.broadcast %cst_40 : f32 to vector<10x1xf32>
    %81 = arith.mulf %79, %80 : vector<10x1xf32>
    %82 = vector.broadcast %81 : vector<10x1xf32> to vector<10x25xf32>
    %83 = arith.subf %77, %82 : vector<10x25xf32>
    %84 = arith.mulf %83, %83 : vector<10x25xf32>
    %cst_41 = arith.constant dense<0.000000e+00> : vector<10xf32>
    %85 = vector.multi_reduction <add>, %84, %cst_41 [1] : vector<10x25xf32> to vector<10xf32>
    %86 = vector.shape_cast %85 : vector<10xf32> to vector<10x1xf32>
    %cst_42 = arith.constant 4.000000e-02 : f32
    %87 = vector.broadcast %cst_42 : f32 to vector<10x1xf32>
    %88 = arith.mulf %86, %87 : vector<10x1xf32>
    %cst_43 = arith.constant 9.99999974E-6 : f32
    %89 = vector.broadcast %cst_43 : f32 to vector<10x1xf32>
    %90 = arith.addf %88, %89 : vector<10x1xf32>
    %91 = math.rsqrt %90 : vector<10x1xf32>
    %92 = vector.broadcast %91 : vector<10x1xf32> to vector<10x25xf32>
    %93 = arith.mulf %83, %92 : vector<10x25xf32>
    %c0_44 = arith.constant 0 : index
    %c4 = arith.constant 4 : index
    %94 = vector.load %arg5[%c0_44, %c4] : memref<10x7xf32, #tpu.memory_space<vmem>>, vector<10x1xf32>
    %95 = vector.broadcast %94 : vector<10x1xf32> to vector<10x25xf32>
    %96 = arith.mulf %93, %95 : vector<10x25xf32>
    %c0_45 = arith.constant 0 : index
    %c5 = arith.constant 5 : index
    %97 = vector.load %arg5[%c0_45, %c5] : memref<10x7xf32, #tpu.memory_space<vmem>>, vector<10x1xf32>
    %98 = vector.broadcast %97 : vector<10x1xf32> to vector<10x25xf32>
    %99 = arith.addf %96, %98 : vector<10x25xf32>
    %c0_46 = arith.constant 0 : index
    %c0_47 = arith.constant 0 : index
    %100 = vector.load %arg6[%c0_46, %c0_47] : memref<10x25xf32, #tpu.memory_space<vmem>>, vector<10x25xf32>
    %101 = arith.mulf %99, %100 : vector<10x25xf32>
    %cst_48 = arith.constant dense<0.000000e+00> : vector<10xf32>
    %102 = vector.multi_reduction <add>, %101, %cst_48 [1] : vector<10x25xf32> to vector<10xf32>
    %103 = vector.shape_cast %102 : vector<10xf32> to vector<10x1xf32>
    %cst_49 = arith.constant dense<0.000000e+00> : vector<1xf32>
    %104 = vector.multi_reduction <add>, %103, %cst_49 [0] : vector<10x1xf32> to vector<1xf32>
    %105 = vector.shape_cast %104 : vector<1xf32> to vector<1x1xf32>
    %c0_50 = arith.constant 0 : index
    %c6 = arith.constant 6 : index
    %106 = vector.load %arg5[%c0_50, %c6] : memref<10x7xf32, #tpu.memory_space<vmem>>, vector<1x1xf32>
    %107 = arith.addf %105, %106 : vector<1x1xf32>
    %cst_51 = arith.constant 0.000000e+00 : f32
    %108 = vector.broadcast %cst_51 : f32 to vector<1x1xf32>
    %109 = arith.subf %108, %107 : vector<1x1xf32>
    %110 = math.exp %109 : vector<1x1xf32>
    %cst_52 = arith.constant 1.000000e+00 : f32
    %111 = vector.broadcast %cst_52 : f32 to vector<1x1xf32>
    %112 = arith.addf %111, %110 : vector<1x1xf32>
    %cst_53 = arith.constant 1.000000e+00 : f32
    %113 = vector.broadcast %cst_53 : f32 to vector<1x1xf32>
    %114 = arith.divf %113, %112 : vector<1x1xf32>
    %c0_54 = arith.constant 0 : index
    %c0_55 = arith.constant 0 : index
    %c0_56 = arith.constant 0 : index
    %115 = vector.load %arg7[%c0_54, %c0_55, %c0_56] : memref<1x1x1xf32, #tpu.memory_space<vmem>>, vector<1x1x1xf32>
    %116 = vector.shape_cast %115 : vector<1x1x1xf32> to vector<1x1xf32>
    %117 = vector.shape_cast %114 : vector<1x1xf32> to vector<1x1x1xf32>
    tpu.vector_store %arg7[%c0_54, %c0_55, %c0_56], %117 {strides = array<i32>} : memref<1x1x1xf32, #tpu.memory_space<vmem>>, vector<1x1x1xf32>,
    return
  }
  func.func @transform_0(%arg0: i32) -> (i32, i32, i32) {
    %c0_i32 = arith.constant 0 : i32
    %c0_i32_0 = arith.constant 0 : i32
    %c0_i32_1 = arith.constant 0 : i32
    return %arg0, %c0_i32, %c0_i32_0 : i32, i32, i32
  }
  func.func @transform_1(%arg0: i32) -> (i32, i32) {
    %c0_i32 = arith.constant 0 : i32
    %c0_i32_0 = arith.constant 0 : i32
    %c0_i32_1 = arith.constant 0 : i32
    return %c0_i32, %c0_i32_0 : i32, i32
  }
  func.func @transform_2(%arg0: i32) -> (i32, i32) {
    %c0_i32 = arith.constant 0 : i32
    %c0_i32_0 = arith.constant 0 : i32
    %c0_i32_1 = arith.constant 0 : i32
    return %c0_i32, %c0_i32_0 : i32, i32
  }
  func.func @transform_3(%arg0: i32) -> (i32, i32) {
    %c0_i32 = arith.constant 0 : i32
    %c0_i32_0 = arith.constant 0 : i32
    %c0_i32_1 = arith.constant 0 : i32
    return %c0_i32, %c0_i32_0 : i32, i32
  }
  func.func @transform_4(%arg0: i32) -> (i32, i32) {
    %c0_i32 = arith.constant 0 : i32
    %c0_i32_0 = arith.constant 0 : i32
    %c0_i32_1 = arith.constant 0 : i32
    return %c0_i32, %c0_i32_0 : i32, i32
  }
  func.func @transform_5(%arg0: i32) -> (i32, i32) {
    %c0_i32 = arith.constant 0 : i32
    %c0_i32_0 = arith.constant 0 : i32
    %c0_i32_1 = arith.constant 0 : i32
    return %c0_i32, %c0_i32_0 : i32, i32
  }
  func.func @transform_6(%arg0: i32) -> (i32, i32, i32) {
    %c0_i32 = arith.constant 0 : i32
    %c0_i32_0 = arith.constant 0 : i32
    %c0_i32_1 = arith.constant 0 : i32
    return %arg0, %c0_i32, %c0_i32_0 : i32, i32, i32
  }
}

</mosaic_0001>

<bundles_post_ra>
// kernel: discriminator_forward.1
= control target key start
LH: loop header
LB: loop body
LE: loop exit
PB: predicated region body
PF: predicated region fallthrough
CT: control target
= control target key end

     0   :  { %s1280_s21 = smov 0   ;;  %s1497_s0 = inlined_call_operand.vmem [shape: f32[4,25,144], index: 0, kind: input, shape index: {}]   ;;  %s1498_s1 = inlined_call_operand.vmem [shape: f32[10,25], index: 1, kind: input, shape index: {}]   ;;  %s1499_s2 = inlined_call_operand.vmem [shape: f32[10,90], index: 2, kind: input, shape index: {}]   ;;  %s1500_s3 = inlined_call_operand.vmem [shape: bf16[144,225], index: 3, kind: input, shape index: {}]   ;;  %s1501_s4 = inlined_call_operand.vmem [shape: f32[10,7], index: 4, kind: input, shape index: {}]   ;;  %s1502_s5 = inlined_call_operand.vmem [shape: f32[10,25], index: 5, kind: input, shape index: {}]   ;;  %s1503_s6 = inlined_call_operand.vmem [shape: f32[4,1,1], index: 6, kind: output, shape index: {}]  }
   0x1 LB: > { %s1107_s22 = sadd.s32 4294967295, %s1221_s21   ;;  %p1111_p0 = scmp.ge.s32.totalorder %s1221_s21, 1  ;;  %s1221_s21 = sphi %s1280_s21, %s16_s21  }
   0x2   : > { %p212_p1 = scmp.lt.s32.totalorder %s1221_s21, 5 }
   0x4   : > { %p213_p2 = pnand %p1111_p0, %p212_p1 }
   0x5   : > { %p240_p3 = scmp.lt.s32.totalorder (!%p213_p2), %s1107_s22, 3  ;;  %s1226_s7 = smov (!%p213_p2), 118  }
   0x6   : > { %216 = sbr.rel (%p213_p2) target bundleno = 1439 (0x59f), region = 44  ;;  %s1227_s8 = smov (!%p213_p2), 88  }
   0x7   : > { %s1228_s9 = smov (!%p213_p2), 98   ;;  %s1229_s10 = smov (!%p213_p2), 108  }
   0x8   : > { %s1230_s11 = smov (!%p213_p2), 28   ;;  %s1231_s12 = smov (!%p213_p2), 53  }
   0x9   : > { %s1232_s13 = smov (!%p213_p2), 103   ;;  %s1233_s14 = smov (!%p213_p2), 78  }
   0xa   : > { %s1234_s15 = smov (!%p213_p2), 58   ;;  %s1235_s16 = smov (!%p213_p2), 48  }
   0xb   : > { %v1291_v0 = vld [vmem:[%s1501_s4] sm:$0xff]  ;;  %v1223_v1 = vmov 0   ;;  %s1505_s22 = smov (!%p240_p3, %s1107_s22), 3  ;;  %vm277_vm0 = vcmask 1040384   ;;  %v1303_v6 = vld [vmem:[%s1501_s4 + $0x8] sm:$0x3] }
   0xc   : > { %1186 = vset.pattern.permute.xlu0 %v1223_v1  ;;  %s1153_s25 = sshll.u32 %s1505_s22, 6  ;;  %v256_v11 = vld [vmem:[%s1498_s1] sm:$0xff]  ;;  %vm270_vm1 = vcmask 203776   ;;  %v257_v12 = vld [vmem:[%s1498_s1 + $0x8] sm:$0x3]  ;;  %vm338_vm2 = vcmask 130048  }
   0xd   : > { %262 = vperm.xlu0 %1186, %v1291_v0   ;;  %s244_s28 = scalar_lea.vmem %s1497_s0, %s1153_s25  ;;  %vm343_vm3 = vcmask 1041408   ;;  %vm345_vm4 = vcmask 123904   ;;  %v1224_v36 = vmov 1   ;;  %v1225_v37 = vmov 2   ;;  %v436_v48 = vld [vmem:[%s1500_s3 + $0x78] sm:$0xff]  ;;  %v435_v49 = vld [vmem:[%s1500_s3 + $0x70] sm:$0xff] }
   0xe   : > { %v254_v2 = vld [vmem:[%s244_s28 + $0x30] sm:$0x1]  ;;  %v255_v3 = vld [vmem:[%s244_s28 + $0x38] sm:$0x1]  ;;  %v252_v4 = vld [vmem:[%s244_s28 + $0x20] sm:$0xff]  ;;  %1188 = vset.pattern.permute.xlu1 %v1225_v37  ;;  %1189 = vset.pattern.permute.xlu2 %v1224_v36  ;;  %v469_v52 = vunpack.c.l.bf16 %v436_v48  ;;  %v467_v53 = vunpack.c.l.bf16 %v435_v49  ;;  %s1236_s17 = smov 3  }
   0xf   : > { %1114 = vmatpush.msk.msra.mxu0 %vm277_vm0, %v254_v2  ;;  %1117 = vmatpush.msk.msra.mxu1 %vm277_vm0, %v255_v3  ;;  %v253_v5 = vld [vmem:[%s244_s28 + $0x28] sm:$0xff]  ;;  %v250_v7 = vld [vmem:[%s244_s28 + $0x10] sm:$0xff]  ;;  %v251_v8 = vld [vmem:[%s244_s28 + $0x18] sm:$0xff]  ;;  %s1237_s18 = smov 56   ;;  %s1238_s19 = smov 106   ;;  %vm588_vm11 = vcmask 80896  }
  0x10   : > { %v248_v9 = vld [vmem:[%s244_s28] sm:$0xff]  ;;  %v249_v10 = vld [vmem:[%s244_s28 + $0x8] sm:$0xff]  ;;  %481 = vmatpush.msra.mxu2 %v469_v52  ;;  %v432_v63 = vld [vmem:[%s1500_s3 + $0x58] sm:$0xff]  ;;  %s1239_s20 = smov 81   ;;  %s1240_s23 = smov 68   ;;  %vm781_vm12 = vcmask 23552  }
  0x11   : > { %297 = vmatpush.msra.mxu0 %v252_v4  ;;  %320 = vmatpush.msra.mxu1 %v253_v5  ;;  %v434_v59 = vld [vmem:[%s1500_s3 + $0x68] sm:$0xff]  ;;  %v433_v61 = vld [vmem:[%s1500_s3 + $0x60] sm:$0xff]  ;;  %v461_v1 = vunpack.c.l.bf16 %v432_v63  ;;  %v431_v2 = vld [vmem:[%s1500_s3 + $0x50] sm:$0xff]  ;;  %vm953_vm13 = vcmask 197632   ;;  %s1244_s30 = smov 122  }
  0x12   : > { %482 = vmatpush.msra.mxu2 %v467_v53  ;;  %v465_v60 = vunpack.c.l.bf16 %v434_v59  ;;  %v463_v62 = vunpack.c.l.bf16 %v433_v61  ;;  %v459_v3 = vunpack.c.l.bf16 %v431_v2  ;;  %v430_v4 = vld [vmem:[%s1500_s3 + $0x48] sm:$0xff] }
  0x13   : > { %298 = vmatpush.msra.mxu0 %v250_v7  ;;  %321 = vmatpush.msra.mxu1 %v251_v8  ;;  %v457_v5 = vunpack.c.l.bf16 %v430_v4  ;;  %v438_v7 = vld [vmem:[%s1500_s3 + $0x88] sm:$0xff] }
  0x14   : > { %483 = vmatpush.msra.mxu2 %v465_v60  ;;  %v473_v8 = vunpack.c.l.bf16 %v438_v7 }
  0x15   : > { %267 = vperm.xlu0 %1186, %v1303_v6   ;;  %299 = vmatpush.msra.mxu0 %v248_v9  ;;  %v429_v9 = vld [vmem:[%s1500_s3 + $0x40] sm:$0xff] }
  0x16   : > { %322 = vmatpush.msra.mxu1 %v249_v10  ;;  %1115 = vmatmul.msk.f32.vlgmr.msra.gmra.mxu0 %vm270_vm1, %v256_v11  ;;  %v455_v10 = vunpack.c.l.bf16 %v429_v9 }
  0x17   : > { %1118 = vmatmul.msk.f32.vlgmr.msra.gmra.mxu1 %vm270_vm1, %v256_v11  ;;  %484 = vmatpush.msra.mxu2 %v463_v62  ;;  %v437_v11 = vld [vmem:[%s1500_s3 + $0x80] sm:$0xff] }
  0x18   : > { %518 = vmatpush.msra.mxu3 %v473_v8 }
  0x19   : > { %485 = vmatpush.msra.mxu2 %v461_v1 }
  0x1b   : > { %486 = vmatpush.msra.mxu2 %v459_v3  ;;  %v1404_v3 = vld [vmem:[%s1499_s2 + $0x8] sm:$0x3] }
  0x1d   : > { %1187 = vset.pattern.permute.xlu0 %v1224_v36  ;;  %487 = vmatpush.msra.mxu2 %v457_v5 }
  0x1e   : > { %1116 = vmatmul.msk.f32.gmra.mxu0 %vm270_vm1, %v257_v12  ;;  %398 = vperm.xlu0 %1187, %v1291_v0  }
  0x1f   : > { %1119 = vmatmul.msk.f32.gmra.mxu1 %vm270_vm1, %v257_v12  ;;  %v471_v12 = vunpack.c.l.bf16 %v437_v11  ;;  %488 = vmatpush.msra.mxu2 %v455_v10 }
  0x21   : > { %519 = vmatpush.msra.mxu3 %v471_v12 }
  0x26   : > { %1190 = vset.pattern.permute.xlu0 %v1225_v37  ;;  %v456_v37 = vunpack.c.h.bf16 %v429_v9 }
  0x27   : > { %414 = vperm.xlu0 %1190, %v1303_v6  }
  0x7f   : > { %v263_v13 = vpop.permute.xlu0 %262 }
  0x87   : > { %v268_v22 = vpop.permute.xlu0 %267 }
  0x90   : > { %v399_v5 = vpop.permute.xlu0 %398 }
  0x93   : > { %v301_v14 = vpop.f32.mrf.mxu0 }
  0x94   : > { %v324_v15 = vpop.f32.mrf.mxu1  ;;  %v302_v16 = vadd.f32 %v301_v14, %v263_v13 }
  0x95   : > { %v325_v17 = vadd.f32 %v324_v15, %v263_v13  ;;  %v428_v13 = vld [vmem:[%s1500_s3 + $0x38] sm:$0xff]  ;;  %v470_v15 = vunpack.c.h.bf16 %v436_v48 }
  0x96   : > { %v330_v18 = vmul.f32 0.02, %v302_v16  ;;  %v453_v14 = vunpack.c.l.bf16 %v428_v13 }
  0x97   : > { %v331_v19 = vmul.f32 0.02, %v325_v17  ;;  %527 = vmatpush.msrb.mxu3 %v470_v15 }
  0x98   : > { %v334_v21 = vmax.f32 %v302_v16, %v330_v18  ;;  %v427_v16 = vld [vmem:[%s1500_s3 + $0x30] sm:$0xff]  ;;  %489 = vmatpush.msra.mxu2 %v453_v14  ;;  %v468_v18 = vunpack.c.h.bf16 %v435_v49 }
  0x99   : > { %v335_v20 = vmax.f32 %v325_v17, %v331_v19  ;;  %v451_v17 = vunpack.c.l.bf16 %v427_v16  ;;  %v426_v19 = vld [vmem:[%s1500_s3 + $0x28] sm:$0xff] }
  0x9a   : > { %528 = vmatpush.msrb.mxu3 %v468_v18 }
  0x9b   : > { %v339_v23 = vsel %vm338_vm2, %v335_v20, 0.0  ;;  %v304_v24 = vpop.f32.mrf.mxu0  ;;  %490 = vmatpush.msra.mxu2 %v451_v17 }
  0x9c   : > { %v327_v25 = vpop.f32.mrf.mxu1  ;;  %v340_v26 = vadd.f32 %v339_v23, %v334_v21  ;;  %v305_v27 = vadd.f32 %v304_v24, %v268_v22  ;;  %v464_v24 = vunpack.c.h.bf16 %v433_v61 }
  0x9d   : > { %v328_v28 = vadd.f32 %v327_v25, %v268_v22  ;;  %v425_v22 = vld [vmem:[%s1500_s3 + $0x20] sm:$0xff]  ;;  %v424_v25 = vld [vmem:[%s1500_s3 + $0x18] sm:$0xff] }
  0x9e   : > { %341 = vadd.xlane.f32.xlu1 %v340_v26  ;;  %v332_v29 = vmul.f32 0.02, %v305_v27  ;;  %v447_v23 = vunpack.c.l.bf16 %v425_v22  ;;  %v445_v26 = vunpack.c.l.bf16 %v424_v25  ;;  %v446_v48 = vunpack.c.h.bf16 %v424_v25 }
  0x9f   : > { %v333_v30 = vmul.f32 0.02, %v328_v28 }
  0xa0   : > { %v336_v31 = vmax.f32 %v305_v27, %v332_v29  ;;  %v462_v27 = vunpack.c.h.bf16 %v432_v63 }
  0xa1   : > { %v337_v32 = vmax.f32 %v328_v28, %v333_v30  ;;  %v423_v28 = vld [vmem:[%s1500_s3 + $0x10] sm:$0xff]  ;;  %v460_v30 = vunpack.c.h.bf16 %v431_v2  ;;  %v1399_v2 = vld [vmem:[%s1499_s2] sm:$0xff] }
  0xa2   : > { %v344_v33 = vsel %vm343_vm3, %v336_v31, 0.0  ;;  %v443_v29 = vunpack.c.l.bf16 %v423_v28  ;;  %v444_v49 = vunpack.c.h.bf16 %v423_v28  ;;  %577 = vrot.lane.b32.xlu0 %v1399_v2, %s1226_s7 }
  0xa3   : > { %v346_v34 = vsel %vm345_vm4, %v337_v32, 0.0 }
  0xa4   : > { %v347_v35 = vadd.f32 %v346_v34, %v344_v33  ;;  %v458_v33 = vunpack.c.h.bf16 %v430_v4  ;;  %v474_v34 = vunpack.c.h.bf16 %v438_v7 }
  0xa6   : > { %348 = vadd.xlane.f32.xlu1 %v347_v35  ;;  %v421_v35 = vld [vmem:[%s1500_s3] sm:$0xff]  ;;  %564 = vmatpush.msrb.mxu0 %v474_v34 }
  0xa7   : > { %v439_v36 = vunpack.c.l.bf16 %v421_v35 }
  0xaa   : > { %689 = vrot.lane.b32.xlu0 %v1404_v3, %s1228_s9 }
  0xb2   : > { %729 = vrot.lane.b32.xlu0 %v1404_v3, %s1227_s8 }
  0xbf   : > { %410 = vperm.xlu1 %1188, %v1291_v0  }
  0xc7   : > { %727 = vrot.lane.b32.xlu1 %v1399_v2, %s1227_s8 }
 0x111   : > { %v342_v38 = vpop.xlane.xlu1 %341 }
 0x112   : > { %v350_v39 = vmul.f32 0.0069444445, %v342_v38  ;;  %v472_v38 = vunpack.c.h.bf16 %v437_v11 }
 0x114   : > { %v1322_v40 = vsub.f32 %v334_v21, %v350_v39  ;;  %v1324_v41 = vsub.f32 %v335_v20, %v350_v39  ;;  %v449_v20 = vunpack.c.l.bf16 %v426_v19  ;;  %v466_v21 = vunpack.c.h.bf16 %v434_v59  ;;  %565 = vmatpush.msrb.mxu0 %v472_v38 }
 0x115   : > { %v454_v39 = vunpack.c.h.bf16 %v428_v13 }
 0x116   : > { %v356_v42 = vmul.f32 %v1322_v40, %v1322_v40  ;;  %v357_v43 = vmul.f32 %v1324_v41, %v1324_v41  ;;  %491 = vmatpush.msra.mxu2 %v449_v20  ;;  %529 = vmatpush.msrb.mxu3 %v466_v21  ;;  %v415_v20 = vpop.permute.xlu0 %414 }
 0x118   : > { %v360_v44 = vsel %vm338_vm2, %v357_v43, 0.0  ;;  %492 = vmatpush.msra.mxu2 %v447_v23  ;;  %530 = vmatpush.msrb.mxu3 %v464_v24 }
 0x119   : > { %v349_v45 = vpop.xlane.xlu1 %348  ;;  %v361_v46 = vadd.f32 %v360_v44, %v356_v42  ;;  %v452_v42 = vunpack.c.h.bf16 %v427_v16 }
 0x11a   : > { %v351_v47 = vmul.f32 0.0069444445, %v349_v45  ;;  %493 = vmatpush.msra.mxu2 %v445_v26  ;;  %531 = vmatpush.msrb.mxu3 %v462_v27  ;;  %v450_v45 = vunpack.c.h.bf16 %v426_v19 }
 0x11b   : > { %362 = vadd.xlane.f32.xlu2 %v361_v46 }
 0x11c   : > { %v1337_v50 = vsub.f32 %v336_v31, %v351_v47  ;;  %v1339_v51 = vsub.f32 %v337_v32, %v351_v47  ;;  %v422_v31 = vld [vmem:[%s1500_s3 + $0x8] sm:$0xff]  ;;  %494 = vmatpush.msra.mxu2 %v443_v29  ;;  %532 = vmatpush.msrb.mxu3 %v460_v30  ;;  %v448_v47 = vunpack.c.h.bf16 %v425_v22 }
 0x11d   : > { %v441_v32 = vunpack.c.l.bf16 %v422_v31  ;;  %v442_v52 = vunpack.c.h.bf16 %v422_v31 }
 0x11e   : > { %v358_v54 = vmul.f32 %v1337_v50, %v1337_v50  ;;  %v359_v55 = vmul.f32 %v1339_v51, %v1339_v51  ;;  %533 = vmatpush.msrb.mxu3 %v458_v33 }
 0x11f   : > { %495 = vmatpush.msra.mxu2 %v441_v32 }
 0x120   : > { %v364_v56 = vsel %vm343_vm3, %v358_v54, 0.0  ;;  %v365_v57 = vsel %vm345_vm4, %v359_v55, 0.0  ;;  %534 = vmatpush.msrb.mxu3 %v456_v37  ;;  %v440_v55 = vunpack.c.h.bf16 %v421_v35 }
 0x121   : > { %v366_v58 = vadd.f32 %v365_v57, %v364_v56  ;;  %496 = vmatpush.msra.mxu2 %v439_v36 }
 0x122   : > { %535 = vmatpush.msrb.mxu3 %v454_v39  ;;  %v578_v39 = vpop.permute.xlu0 %577 }
 0x123   : > { %367 = vadd.xlane.f32.xlu2 %v366_v58 }
 0x124   : > { %536 = vmatpush.msrb.mxu3 %v452_v42 }
 0x126   : > { %537 = vmatpush.msrb.mxu3 %v450_v45 }
 0x128   : > { %538 = vmatpush.msrb.mxu3 %v448_v47 }
 0x12a   : > { %539 = vmatpush.msrb.mxu3 %v446_v48 }
 0x12c   : > { %540 = vmatpush.msrb.mxu3 %v444_v49 }
 0x12e   : > { %541 = vmatpush.msrb.mxu3 %v442_v52 }
 0x130   : > { %542 = vmatpush.msrb.mxu3 %v440_v55 }
 0x131   : > { %v411_v11 = vpop.permute.xlu1 %410 }
 0x13b   : > { %402 = vperm.xlu2 %1189, %v1303_v6  }
 0x143   : > { %579 = vrot.lane.b32.xlu2 %v1404_v3, %s1226_s7 }
 0x14b   : > { %687 = vrot.lane.b32.xlu2 %v1399_v2, %s1228_s9  ;;  %s247_s9 = scalar_lea.vmem %s1503_s6, %s1505_s22 }
 0x153   : > { %647 = vrot.lane.b32.xlu2 %v1399_v2, %s1229_s10 }
 0x18e   : > { %v363_v43 = vpop.xlane.xlu2 %362 }
 0x18f   : > { %v369_v44 = vmul.f32 0.0069444445, %v363_v43  ;;  %v690_v43 = vpop.permute.xlu0 %689 }
 0x191   : > { %v371_v46 = vadd.f32 1e-05, %v369_v44 }
 0x193   : > { %1203 = vrsqrt.f32 %v371_v46  ;;  %vm379_vm6 = vweird.f32 %v371_v46 }
 0x196   : > { %v368_v53 = vpop.xlane.xlu2 %367 }
 0x197   : > { %v370_v54 = vmul.f32 0.0069444445, %v368_v53  ;;  %v730_v45 = vpop.permute.xlu0 %729 }
 0x199   : > { %v1204_v56 = vpop.eup %1203  ;;  %v372_v57 = vadd.f32 1e-05, %v370_v54 }
 0x19a   : > { %v374_v58 = vmul.f32 %v1204_v56, %v371_v46  ;;  %vm380_vm5 = vweird.f32 %v1204_v56  ;;  %v728_v46 = vpop.permute.xlu1 %727 }
 0x19b   : > { %1205 = vrsqrt.f32 %v372_v57  ;;  %vm381_vm7 = vmor %vm379_vm6, %vm380_vm5  ;;  %vm389_vm9 = vweird.f32 %v372_v57 }
 0x19c   : > { %v375_v59 = vmul.f32 %v1204_v56, %v374_v58 }
 0x19e   : > { %v376_v60 = vmul.f32 0.5, %v375_v59 }
 0x1a0   : > { %v377_v61 = vsub.f32 1.5, %v376_v60 }
 0x1a1   : > { %v1206_v62 = vpop.eup %1205 }
 0x1a2   : > { %v384_v63 = vmul.f32 %v1206_v62, %v372_v57  ;;  %v378_v1 = vmul.f32 %v1204_v56, %v377_v61  ;;  %vm390_vm8 = vweird.f32 %v1206_v62 }
 0x1a3   : > { %vm391_vm10 = vmor %vm389_vm9, %vm390_vm8  ;;  %vm1058_vm8 = vcmask 0  }
 0x1a4   : > { %v385_v4 = vmul.f32 %v1206_v62, %v384_v63  ;;  %v382_v7 = vsel %vm381_vm7, %v1204_v56, %v378_v1 }
 0x1a5   : > { %v393_v8 = vmul.f32 %v382_v7, %v1322_v40  ;;  %v394_v9 = vmul.f32 %v382_v7, %v1324_v41  ;;  %v403_v41 = vpop.permute.xlu2 %402 }
 0x1a6   : > { %v386_v10 = vmul.f32 0.5, %v385_v4 }
 0x1a7   : > { %v405_v12 = vmul.f32 %v399_v5, %v393_v8  ;;  %v406_v13 = vmul.f32 %v399_v5, %v394_v9  ;;  %v1241_v5 = vmov 3  }
 0x1a8   : > { %v387_v14 = vsub.f32 1.5, %v386_v10  ;;  %1197 = vset.pattern.permute.xlu1 %v1241_v5  ;;  %1196 = vset.pattern.permute.xlu2 %v1241_v5 }
 0x1a9   : > { %v418_v15 = vadd.f32 %v411_v11, %v406_v13  ;;  %v417_v16 = vadd.f32 %v411_v11, %v405_v12 }
 0x1aa   : > { %v388_v17 = vmul.f32 %v1206_v62, %v387_v14 }
 0x1ab   : > { %497 = vmatmul.f32.vlgmr.msra.gmra.mxu2 %v417_v16  ;;  %1120 = vmatmul.msk.f32.vlgmr.msra.gmra.mxu3 %vm338_vm2, %v418_v15 }
 0x1ac   : > { %1122 = vmatmul.msk.f32.vlgmr.msrb.gmra.mxu0 %vm338_vm2, %v418_v15  ;;  %v392_v40 = vsel %vm391_vm10, %v1206_v62, %v388_v17 }
 0x1ad   : > { %v395_v18 = vmul.f32 %v392_v40, %v1337_v50  ;;  %v396_v19 = vmul.f32 %v392_v40, %v1339_v51  ;;  %v580_v36 = vpop.permute.xlu2 %579 }
 0x1af   : > { %v407_v21 = vmul.f32 %v403_v41, %v395_v18  ;;  %v408_v22 = vmul.f32 %v403_v41, %v396_v19 }
 0x1b1   : > { %v420_v23 = vadd.f32 %v415_v20, %v408_v22  ;;  %v419_v24 = vadd.f32 %v415_v20, %v407_v21 }
 0x1b3   : > { %500 = vmatmul.f32.gmra.mxu2 %v419_v24  ;;  %1121 = vmatmul.msk.f32.gmra.mxu3 %vm338_vm2, %v420_v23 }
 0x1b4   : > { %1123 = vmatmul.msk.f32.gmra.mxu0 %vm338_vm2, %v420_v23 }
 0x1b5   : > { %v688_v37 = vpop.permute.xlu2 %687 }
 0x1bb   : > { %543 = vmatmul.f32.vlgmr.msrb.gmra.mxu3 %v417_v16 }
 0x1bd   : > { %v648_v38 = vpop.permute.xlu2 %647 }
 0x1c3   : > { %546 = vmatmul.f32.gmra.mxu3 %v419_v24 }
 0x229   : > { %v567_v30 = vpop.f32.mrf.mxu0 }
 0x22e   : > { %v498_v50 = vpop.f32.mrf.mxu2  ;;  %v521_v51 = vpop.f32.mrf.mxu3 }
 0x22f   : > { %v522_v25 = vadd.f32 %v521_v51, %v498_v50  ;;  %v1242_v50 = vmov 4  }
 0x230   : > { %1198 = vset.pattern.permute.xlu0 %v1242_v50 }
 0x231   : > { %731 = vrot.lane.b32.xlu2 %v522_v25, %s1230_s11  ;;  %691 = vrot.lane.b32.xlu0 %v522_v25, %s1231_s12  ;;  %v570_v34 = vpop.f32.mrf.mxu0 }
 0x232   : > { %583 = vrot.lane.b32.xlu1 %v522_v25, %s1232_s13 }
 0x236   : > { %v501_v26 = vpop.f32.mrf.mxu2  ;;  %v524_v27 = vpop.f32.mrf.mxu3 }
 0x237   : > { %v525_v28 = vadd.f32 %v524_v27, %v501_v26 }
 0x239   : > { %651 = vrot.lane.b32.xlu0 %v522_v25, %s1233_s14  ;;  %585 = vrot.lane.b32.xlu2 %v525_v28, %s1232_s13 }
 0x23a   : > { %856 = vrot.lane.b32.xlu1 %v1399_v2, %s1234_s15  ;;  %1127 = vmatpush.msk.msra.mxu0 %vm343_vm3, %v525_v28 }
 0x23c   : > { %639 = vmatpush.msra.mxu0 %v522_v25 }
 0x23d   : > { %1128 = vmatmul.msk.f32.vlgmr.msra.gmra.mxu0 %vm588_vm11, %v1399_v2 }
 0x23e   : > { %v544_v29 = vpop.f32.mrf.mxu3 }
 0x23f   : > { %v568_v31 = vadd.f32 %v567_v30, %v544_v29 }
 0x241   : > { %896 = vrot.lane.b32.xlu0 %v1399_v2, %s1235_s16  ;;  %649 = vrot.lane.b32.xlu2 %v1404_v3, %s1229_s10  ;;  %v1191_v32 = vpack.i.bf16 %v568_v31, %v522_v25 }
 0x242   : > { %767 = vrot.lane.b32.xlu1 %v1399_v2, %s1233_s14 }
 0x245   : > { %1129 = vmatmul.msk.f32.gmra.mxu0 %vm588_vm11, %v1404_v3 }
 0x246   : > { %v547_v33 = vpop.f32.mrf.mxu3 }
 0x247   : > { %v571_v35 = vadd.f32 %v570_v34, %v547_v33 }
 0x249   : > { %777 = vrot.lane.b32.xlu0 %v525_v28, %s1236_s17  ;;  %1192 = vrot.lane.b32.xlu2 %v1191_v32, %s1236_s17 }
 0x24a   : > { %693 = vrot.lane.b32.xlu1 %v525_v28, %s1231_s12 }
 0x251   : > { %902 = vrot.lane.b32.xlu0 %v571_v35, %s1237_s18  ;;  %900 = vrot.lane.b32.xlu2 %v568_v31, %s1237_s18 }
 0x252   : > { %653 = vrot.lane.b32.xlu1 %v525_v28, %s1233_s14 }
 0x259   : > { %822 = vrot.lane.b32.xlu0 %v571_v35, %s1238_s19  ;;  %779 = vrot.lane.b32.xlu2 %v571_v35, %s1236_s17 }
 0x25a   : > { %733 = vrot.lane.b32.xlu1 %v525_v28, %s1230_s11 }
 0x261   : > { %820 = vrot.lane.b32.xlu2 %v568_v31, %s1238_s19  ;;  %858 = vrot.lane.b32.xlu0 %v1404_v3, %s1234_s15 }
 0x262   : > { %860 = vrot.lane.b32.xlu1 %v568_v31, %s1239_s20 }
 0x269   : > { %818 = vrot.lane.b32.xlu0 %v1404_v3, %s1240_s23  ;;  %769 = vrot.lane.b32.xlu2 %v1404_v3, %s1233_s14 }
 0x26a   : > { %862 = vrot.lane.b32.xlu1 %v571_v35, %s1239_s20 }
 0x271   : > { %941 = vperm.xlu2 %1196, %v1303_v6  }
 0x272   : > { %816 = vrot.lane.b32.xlu1 %v1399_v2, %s1240_s23 }
 0x27a   : > { %898 = vrot.lane.b32.xlu1 %v1404_v3, %s1235_s16 }
 0x282   : > { %937 = vperm.xlu1 %1197, %v1291_v0  }
 0x28a   : > { %1199 = vset.pattern.permute.xlu1 %v1242_v50 }
 0x28b   : > { %v732_v42 = vpop.permute.xlu2 %731  ;;  %996 = vperm.xlu1 %1199, %v1291_v0  }
 0x293   : > { %v586_v44 = vpop.permute.xlu2 %585 }
 0x294   : > { %1124 = vmatpush.msk.msrb.mxu1 %vm343_vm3, %v586_v44 }
 0x29b   : > { %v650_v49 = vpop.permute.xlu2 %649 }
 0x2a3   : > { %v692_v47 = vpop.permute.xlu0 %691  ;;  %v1193_v54 = vpop.permute.xlu2 %1192 }
 0x2a4   : > { %v584_v48 = vpop.permute.xlu1 %583  ;;  %v1195_v3 = vunpack.i.h.bf16 %v1193_v54  ;;  %v1194_v4 = vunpack.i.l.bf16 %v1193_v54 }
 0x2a5   : > { %610 = vmatpush.msrb.mxu1 %v584_v48 }
 0x2a6   : > { %1125 = vmatmul.msk.f32.vlgmr.msrb.gmra.mxu1 %vm588_vm11, %v578_v39  ;;  %v782_v8 = vsel %vm781_vm12, %v1194_v4, %v1195_v3 }
 0x2ab   : > { %v652_v52 = vpop.permute.xlu0 %651  ;;  %v901_v57 = vpop.permute.xlu2 %900 }
 0x2ac   : > { %v857_v53 = vpop.permute.xlu1 %856 }
 0x2ae   : > { %1126 = vmatmul.msk.f32.gmra.mxu1 %vm588_vm11, %v580_v36 }
 0x2b3   : > { %v897_v55 = vpop.permute.xlu0 %896  ;;  %v780_v60 = vpop.permute.xlu2 %779 }
 0x2b4   : > { %v768_v56 = vpop.permute.xlu1 %767 }
 0x2ba   : > { %v641_v17 = vpop.f32.mrf.mxu0 }
 0x2bb   : > { %v778_v58 = vpop.permute.xlu0 %777  ;;  %v821_v2 = vpop.permute.xlu2 %820 }
 0x2bc   : > { %v694_v59 = vpop.permute.xlu1 %693  ;;  %v783_v7 = vsel %vm781_vm12, %v778_v58, %v780_v60 }
 0x2bd   : > { %1133 = vmatpush.msk.msrb.mxu2 %vm343_vm3, %v694_v59 }
 0x2bf   : > { %717 = vmatpush.msrb.mxu2 %v692_v47 }
 0x2c0   : > { %1134 = vmatmul.msk.f32.vlgmr.msrb.gmra.mxu2 %vm588_vm11, %v688_v37 }
 0x2c2   : > { %v644_v41 = vpop.f32.mrf.mxu0 }
 0x2c3   : > { %v903_v61 = vpop.permute.xlu0 %902  ;;  %v770_v11 = vpop.permute.xlu2 %769 }
 0x2c4   : > { %v654_v62 = vpop.permute.xlu1 %653 }
 0x2c5   : > { %1130 = vmatpush.msk.msra.mxu1 %vm343_vm3, %v654_v62 }
 0x2c7   : > { %677 = vmatpush.msra.mxu1 %v652_v52 }
 0x2c8   : > { %1131 = vmatmul.msk.f32.vlgmr.msra.gmra.mxu1 %vm588_vm11, %v648_v38  ;;  %1135 = vmatmul.msk.f32.gmra.mxu2 %vm588_vm11, %v690_v43 }
 0x2cb   : > { %v823_v63 = vpop.permute.xlu0 %822 }
 0x2cc   : > { %v734_v1 = vpop.permute.xlu1 %733  ;;  %1142 = vmatpush.msk.msrb.mxu1 %vm343_vm3, %v823_v63 }
 0x2cd   : > { %1136 = vmatpush.msk.msrb.mxu0 %vm343_vm3, %v734_v1  ;;  %1154 = vmatpush.msk.msra.mxu3 %vm343_vm3, %v734_v1 }
 0x2ce   : > { %846 = vmatpush.msrb.mxu1 %v821_v2 }
 0x2cf   : > { %757 = vmatpush.msrb.mxu0 %v732_v42  ;;  %1155 = vmatpush.msra.mxu3 %v732_v42 }
 0x2d0   : > { %1132 = vmatmul.msk.f32.gmra.mxu1 %vm588_vm11, %v650_v49  ;;  %1137 = vmatmul.msk.f32.vlgmr.msrb.gmra.mxu0 %vm588_vm11, %v728_v46 }
 0x2d1   : > { %1138 = vmatmul.msk.f32.vlgmr.msra.gmra.mxu3 %vm588_vm11, %v730_v45  ;;  %1139 = vmatpush.msk.msra.mxu0 %vm343_vm3, %v783_v7 }
 0x2d2   : > { %1148 = vmatpush.msk.msrb.mxu3 %vm343_vm3, %v903_v61  ;;  %v1243_v61 = vmov 5  }
 0x2d3   : > { %806 = vmatpush.msra.mxu0 %v782_v8  ;;  %v859_v12 = vpop.permute.xlu0 %858  ;;  %1201 = vset.pattern.permute.xlu1 %v1243_v61 }
 0x2d4   : > { %926 = vmatpush.msrb.mxu3 %v901_v57  ;;  %v861_v9 = vpop.permute.xlu1 %860  ;;  %1200 = vset.pattern.permute.xlu2 %v1243_v61 }
 0x2d8   : > { %1140 = vmatmul.msk.f32.vlgmr.msra.gmra.mxu0 %vm588_vm11, %v768_v56 }
 0x2d9   : > { %1149 = vmatmul.msk.f32.vlgmr.msrb.gmra.mxu3 %vm588_vm11, %v897_v55  ;;  %v942_v55 = vpop.permute.xlu2 %941 }
 0x2db   : > { %v819_v14 = vpop.permute.xlu0 %818 }
 0x2dc   : > { %v863_v10 = vpop.permute.xlu1 %862 }
 0x2dd   : > { %1145 = vmatpush.msk.msra.mxu2 %vm343_vm3, %v863_v10 }
 0x2df   : > { %886 = vmatpush.msra.mxu2 %v861_v9 }
 0x2e0   : > { %1141 = vmatmul.msk.f32.gmra.mxu0 %vm588_vm11, %v770_v11  ;;  %1146 = vmatmul.msk.f32.vlgmr.msra.gmra.mxu2 %vm588_vm11, %v857_v53 }
 0x2e4   : > { %v817_v13 = vpop.permute.xlu1 %816 }
 0x2e5   : > { %1143 = vmatmul.msk.f32.vlgmr.msrb.gmra.mxu1 %vm588_vm11, %v817_v13 }
 0x2e8   : > { %1147 = vmatmul.msk.f32.gmra.mxu2 %vm588_vm11, %v859_v12 }
 0x2ec   : > { %v899_v15 = vpop.permute.xlu1 %898 }
 0x2ed   : > { %1144 = vmatmul.msk.f32.gmra.mxu1 %vm588_vm11, %v819_v14  ;;  %1150 = vmatmul.msk.f32.gmra.mxu3 %vm588_vm11, %v899_v15 }
 0x2f4   : > { %v938_v36 = vpop.permute.xlu1 %937 }
 0x2fd   : > { %v997_v12 = vpop.permute.xlu1 %996 }
 0x323   : > { %v612_v16 = vpop.f32.mrf.mxu1 }
 0x324   : > { %v642_v21 = vadd.f32 %v641_v17, %v612_v16 }
 0x32b   : > { %v615_v40 = vpop.f32.mrf.mxu1 }
 0x32c   : > { %v645_v27 = vadd.f32 %v644_v41, %v615_v40 }
 0x343   : > { %v719_v19 = vpop.f32.mrf.mxu2 }
 0x345   : > { %v679_v18 = vpop.f32.mrf.mxu1 }
 0x346   : > { %v685_v22 = vadd.f32 %v679_v18, %v642_v21 }
 0x348   : > { %v725_v26 = vadd.f32 %v719_v19, %v685_v22 }
 0x34b   : > { %v722_v24 = vpop.f32.mrf.mxu2 }
 0x34d   : > { %v759_v20 = vpop.f32.mrf.mxu0  ;;  %v682_v23 = vpop.f32.mrf.mxu1 }
 0x34e   : > { %v765_v28 = vadd.f32 %v759_v20, %v725_v26  ;;  %v686_v29 = vadd.f32 %v682_v23, %v645_v27 }
 0x350   : > { %v726_v34 = vadd.f32 %v722_v24, %v686_v29 }
 0x354   : > { %v762_v51 = vpop.f32.mrf.mxu3 }
 0x355   : > { %v808_v25 = vpop.f32.mrf.mxu0  ;;  %v766_v39 = vadd.f32 %v762_v51, %v726_v34  ;;  %v1016_v34 = vld [vmem:[%s1502_s5 + $0x8] sm:$0x3] }
 0x356   : > { %v814_v30 = vadd.f32 %v808_v25, %v765_v28 }
 0x35c   : > { %v928_v37 = vpop.f32.mrf.mxu3 }
 0x35d   : > { %v811_v38 = vpop.f32.mrf.mxu0 }
 0x35e   : > { %v815_v43 = vadd.f32 %v811_v38, %v766_v39 }
 0x362   : > { %v848_v31 = vpop.f32.mrf.mxu1 }
 0x363   : > { %v854_v32 = vadd.f32 %v848_v31, %v814_v30  ;;  %v888_v33 = vpop.f32.mrf.mxu2  ;;  %v1015_v31 = vld [vmem:[%s1502_s5] sm:$0xff] }
 0x365   : > { %v894_v35 = vadd.f32 %v888_v33, %v854_v32 }
 0x367   : > { %v934_v42 = vadd.f32 %v928_v37, %v894_v35 }
 0x369   : > { %v944_v44 = vadd.f32 %v938_v36, %v934_v42 }
 0x36a   : > { %v851_v45 = vpop.f32.mrf.mxu1 }
 0x36b   : > { %v946_v46 = vmul.f32 0.02, %v944_v44  ;;  %v855_v47 = vadd.f32 %v851_v45, %v815_v43  ;;  %v891_v48 = vpop.f32.mrf.mxu2 }
 0x36d   : > { %v948_v49 = vmax.f32 %v944_v44, %v946_v46  ;;  %v895_v52 = vadd.f32 %v891_v48, %v855_v47 }
 0x36f   : > { %v950_v53 = vsel %vm270_vm1, %v948_v49, 0.0 }
 0x370   : > { %v931_v54 = vpop.f32.mrf.mxu3  ;;  %951 = vadd.xlane.f32.xlu2 %v950_v53  ;;  %v1033_v53 = vld [vmem:[%s1501_s4] sm:$0x1] }
 0x371   : > { %v935_v56 = vadd.f32 %v931_v54, %v895_v52 }
 0x373   : > { %v945_v57 = vadd.f32 %v942_v55, %v935_v56 }
 0x375   : > { %v947_v58 = vmul.f32 0.02, %v945_v57 }
 0x377   : > { %v949_v59 = vmax.f32 %v945_v57, %v947_v58 }
 0x379   : > { %v954_v60 = vsel %vm953_vm13, %v949_v59, 0.0 }
 0x37a   : > { %955 = vadd.xlane.f32.xlu0 %v954_v60 }
 0x38e   : > { %1000 = vperm.xlu0 %1198, %v1303_v6  }
 0x396   : > { %1202 = vset.pattern.permute.xlu0 %v1243_v61 }
 0x3e3   : > { %v952_v62 = vpop.xlane.xlu2 %951 }
 0x3e4   : > { %v957_v63 = vmul.f32 0.04, %v952_v62 }
 0x3e6   : > { %v959_v1 = vsub.f32 %v948_v49, %v957_v63 }
 0x3e8   : > { %v961_v2 = vmul.f32 %v959_v1, %v959_v1 }
 0x3ea   : > { %v963_v3 = vsel %vm270_vm1, %v961_v2, 0.0 }
 0x3eb   : > { %964 = vadd.xlane.f32.xlu2 %v963_v3 }
 0x3ed   : > { %v956_v4 = vpop.xlane.xlu0 %955 }
 0x3ee   : > { %v958_v5 = vmul.f32 0.04, %v956_v4 }
 0x3f0   : > { %v960_v7 = vsub.f32 %v949_v59, %v958_v5 }
 0x3f2   : > { %v962_v8 = vmul.f32 %v960_v7, %v960_v7 }
 0x3f4   : > { %v966_v9 = vsel %vm953_vm13, %v962_v8, 0.0 }
 0x3f5   : > { %967 = vadd.xlane.f32.xlu1 %v966_v9 }
 0x400   : > { %v1001_v25 = vpop.permute.xlu0 %1000 }
 0x403   : > { %1010 = vperm.xlu2 %1200, %v1303_v6  }
 0x40e   : > { %1006 = vperm.xlu1 %1201, %v1291_v0  }
 0x45e   : > { %v965_v10 = vpop.xlane.xlu2 %964 }
 0x45f   : > { %v969_v11 = vmul.f32 0.04, %v965_v10 }
 0x461   : > { %v971_v13 = vadd.f32 1e-05, %v969_v11 }
 0x463   : > { %1207 = vrsqrt.f32 %v971_v13  ;;  %vm979_vm15 = vweird.f32 %v971_v13 }
 0x466   : > { %v1011_v30 = vpop.permute.xlu2 %1010 }
 0x468   : > { %v968_v14 = vpop.xlane.xlu1 %967 }
 0x469   : > { %v1208_v15 = vpop.eup %1207  ;;  %v970_v16 = vmul.f32 0.04, %v968_v14 }
 0x46a   : > { %v974_v17 = vmul.f32 %v1208_v15, %v971_v13  ;;  %vm980_vm14 = vweird.f32 %v1208_v15 }
 0x46b   : > { %v972_v40 = vadd.f32 1e-05, %v970_v16  ;;  %vm981_vm0 = vmor %vm979_vm15, %vm980_vm14 }
 0x46c   : > { %v975_v41 = vmul.f32 %v1208_v15, %v974_v17 }
 0x46d   : > { %1209 = vrsqrt.f32 %v972_v40  ;;  %vm989_vm4 = vweird.f32 %v972_v40 }
 0x46e   : > { %v976_v18 = vmul.f32 0.5, %v975_v41 }
 0x470   : > { %v977_v19 = vsub.f32 1.5, %v976_v18 }
 0x472   : > { %v978_v6 = vmul.f32 %v1208_v15, %v977_v19 }
 0x473   : > { %v1210_v20 = vpop.eup %1209 }
 0x474   : > { %v984_v21 = vmul.f32 %v1210_v20, %v972_v40  ;;  %v982_v23 = vsel %vm981_vm0, %v1208_v15, %v978_v6  ;;  %vm990_vm2 = vweird.f32 %v1210_v20 }
 0x475   : > { %v993_v50 = vmul.f32 %v982_v23, %v959_v1  ;;  %vm991_vm5 = vmor %vm989_vm4, %vm990_vm2 }
 0x476   : > { %v985_v0 = vmul.f32 %v1210_v20, %v984_v21 }
 0x477   : > { %v1003_v28 = vmul.f32 %v997_v12, %v993_v50 }
 0x478   : > { %v986_v22 = vmul.f32 0.5, %v985_v0 }
 0x47a   : > { %v987_v24 = vsub.f32 1.5, %v986_v22 }
 0x47c   : > { %v988_v51 = vmul.f32 %v1210_v20, %v987_v24 }
 0x47e   : > { %v992_v26 = vsel %vm991_vm5, %v1210_v20, %v988_v51 }
 0x47f   : > { %v994_v27 = vmul.f32 %v992_v26, %v960_v7 }
 0x480   : > { %v1007_v29 = vpop.permute.xlu1 %1006 }
 0x481   : > { %v1004_v32 = vmul.f32 %v1001_v25, %v994_v27  ;;  %v1013_v33 = vadd.f32 %v1007_v29, %v1003_v28 }
 0x483   : > { %v1014_v35 = vadd.f32 %v1011_v30, %v1004_v32  ;;  %v1017_v36 = vmul.f32 %v1015_v31, %v1013_v33 }
 0x485   : > { %v1019_v37 = vsel %vm270_vm1, %v1017_v36, 0.0  ;;  %v1018_v38 = vmul.f32 %v1016_v34, %v1014_v35 }
 0x486   : > { %1020 = vadd.xlane.f32.xlu1 %v1019_v37 }
 0x487   : > { %v1022_v39 = vsel %vm953_vm13, %v1018_v38, 0.0 }
 0x488   : > { %1023 = vadd.xlane.f32.xlu2 %v1022_v39 }
 0x4f9   : > { %v1021_v43 = vpop.xlane.xlu1 %1020 }
 0x4fb   : > { %v1024_v42 = vpop.xlane.xlu2 %1023 }
 0x4fc   : > { %v1025_v44 = vsel %vm343_vm3, %v1024_v42, 0.0 }
 0x4fd   : > { %v1026_v45 = vadd.f32 %v1025_v44, %v1021_v43 }
 0x4ff   : > { %v1027_v46 = vrot.slane %v1026_v45, 4 }
 0x501   : > { %v1028_v47 = vadd.f32 %v1027_v46, %v1026_v45 }
 0x503   : > { %v1029_v48 = vrot.slane %v1028_v47, 2 }
 0x505   : > { %v1030_v49 = vadd.f32 %v1029_v48, %v1028_v47 }
 0x507   : > { %v1031_v52 = vrot.slane %v1030_v49, 1 }
 0x509   : > { %v1032_v54 = vadd.f32 %v1031_v52, %v1030_v49 }
 0x50b   : > { %v1034_v55 = vadd.f32 %v1033_v53, %v1032_v54 }
 0x50d   : > { %v1035_v56 = vsub.f32 0.0, %v1034_v55 }
 0x50f   : > { %v1036_v57 = vmul.f32 1.442695, %v1035_v56 }
 0x511   : > { %1211 = vpow2.f32 %v1036_v57 }
 0x517   : > { %v1212_v58 = vpop.eup %1211 }
 0x518   : > { %v1038_v59 = vadd.f32 1.0, %v1212_v58 }
 0x51a   : > { %1213 = vrcp.f32 %v1038_v59  ;;  %v1050_v63 = vand.u32 2147483648, %v1038_v59  ;;  %v1048_v2 = vand.u32 2147483647, %v1038_v59  ;;  %vm1044_vm3 = vweird.f32 %v1038_v59 }
 0x51c   : > { %v1051_v4 = vor.u32 1.1754944e-38, %v1050_v63  ;;  %vm1049_vm7 = vcmp.eq.f32.partialorder %v1048_v2, 8.507059e+37 }
 0x520   : > { %v1214_v60 = vpop.eup %1213 }
 0x521   : > { %v1040_v61 = vmul.f32 %v1214_v60, %v1038_v59  ;;  %vm1045_vm1 = vweird.f32 %v1214_v60 }
 0x522   : > { %vm1046_vm6 = vmor %vm1044_vm3, %vm1045_vm1 }
 0x523   : > { %v1041_v62 = vsub.f32 1.0, %v1040_v61 }
 0x525   : > { %v1042_v1 = vmul.f32 %v1214_v60, %v1041_v62 }
 0x527   : > { %v1043_v3 = vadd.f32 %v1214_v60, %v1042_v1 }
 0x529   : > { %v1047_v5 = vsel %vm1046_vm6, %v1214_v60, %v1043_v3 }
 0x52a   : > { %v1052_v7 = vsel %vm1049_vm7, %v1051_v4, %v1047_v5 }
 0x52b   : > { %1055 = vrot.lane.b32.xlu0 %v1052_v7, %s1244_s30 }
 0x59d   : > { %v1056_v8 = vpop.permute.xlu0 %1055 }
 0x59e   : > { %1059 = vst.msk [vmem:[%s247_s9] sm:$0x1] %vm1058_vm8, %v1056_v8 }
 0x59f PF: > { %s16_s21 = sadd.s32 1, %s1221_s21  }
 0x5a0   : > { %p13_p4 = scmp.ge.s32.totalorder %s16_s21, 6  }
 0x5a2   :  { %15 = sbr.rel (!%p13_p4) target bundleno = 1 (0x1), region = 74 }

</bundles_post_ra>
